<compile_context>
chip_gen: v5e
topology: v5e:2x2
jax: 0.10.0
libtpu: 0.0.40
codegen_flags: <defaults>
</compile_context>

<pallas_src>
import functools

import jax
import jax.numpy as jnp
from jax.experimental import pallas as pl
from jax.experimental.pallas import tpu as pltpu

SELF_ATTEN_VALUE = -100000.0
# Functionally identical to torch's -finfo(f32).max (exp underflows to exactly
# 0 either way, every row keeps its self entry at ~-1e5) but robust against
# the subsequent -log(dup + 1e-9) correction.
BUCKET_MASK_VALUE = -1e9


# ----------------------------------------------------------------------------
# Pallas kernels
# ----------------------------------------------------------------------------
def _linear_kernel(x_ref, w_ref, b_ref, o_ref):
    # o = x @ w + b    (x: (TM, Din), w: (Din, Dout), b: (1, Dout))
    o_ref[...] = (
        jnp.dot(x_ref[...], w_ref[...], preferred_element_type=jnp.float32)
        + b_ref[...]
    )


def pallas_linear(x, w, b):
    M, Din = x.shape
    Dout = w.shape[1]
    # M-tiled so activations pipeline (weights/bias stay resident).
    TM = M
    for cand in (512, 256, 128, 64, 32, 16, 8):
        if M % cand == 0:
            TM = cand
            break
    return pl.pallas_call(
        _linear_kernel,
        out_shape=jax.ShapeDtypeStruct((M, Dout), jnp.float32),
        grid=(M // TM,),
        in_specs=[
            pl.BlockSpec((TM, Din), lambda i: (i, 0)),
            pl.BlockSpec((Din, Dout), lambda i: (0, 0)),
            pl.BlockSpec((1, Dout), lambda i: (0, 0)),
        ],
        out_specs=pl.BlockSpec((TM, Dout), lambda i: (i, 0)),
        compiler_params=pltpu.CompilerParams(
            dimension_semantics=("parallel",)),
    )(x, w, b)


def _lsh_attn_kernel(offsets, n_chunks, round_num, scale, *refs):
    # One (batch, head, round, query-chunk) tile per grid step.
    nb = len(offsets)
    assert len(refs) == 3 + 4 * nb + 2
    q_ref, bq_ref, locq_ref = refs[:3]
    k_refs = refs[3:3 + nb]
    v_refs = refs[3 + nb:3 + 2 * nb]
    bk_refs = refs[3 + 2 * nb:3 + 3 * nb]
    lk_refs = refs[3 + 3 * nb:3 + 4 * nb]
    vo_ref = refs[3 + 4 * nb]
    lse_ref = refs[3 + 4 * nb + 1]

    q = q_ref[0, 0]                      # (W, K) bf16 (un-normalized qk)
    bq = bq_ref[0, 0]                    # (W, 1) int32 bucket id (this round)
    locq = locq_ref[0, 0]                # (W, R) int32 bucket ids (all rounds)
    W, K = q.shape

    # Online-softmax running state (exact; flash-style rescaling).
    m = jnp.full((W, 1), -1e30, jnp.float32)
    l = jnp.zeros((W, 1), jnp.float32)
    acc = jnp.zeros((W, K), jnp.float32)

    row_ids = jax.lax.broadcasted_iota(jnp.int32, (W, W), 0)
    col_ids = jax.lax.broadcasted_iota(jnp.int32, (W, W), 1)

    for idx, off in enumerate(offsets):          # static unroll over neighbours
        k_raw = k_refs[idx][0, 0]                # (W, K) bf16 (raw qk)
        v_o = v_refs[idx][0, 0]                  # (W, K) bf16
        bk_o = bk_refs[idx][0, 0]                # (1, W) int32
        lk_o = lk_refs[idx][0, 0]                # (R, W) int32

        # L2-normalize the key rows in-kernel (F.normalize(p=2, dim=-1)).
        # VPU + EUP work on a tiny tile; replaces a full-tensor XLA pass.
        k_f = k_raw.astype(jnp.float32)
        k_norm = jnp.sqrt(jnp.sum(k_f * k_f, axis=-1, keepdims=True))
        k_n = (k_f * (1.0 / jnp.maximum(k_norm, 1e-12))).astype(jnp.bfloat16)

        # dots = q @ k^T * k_dim^-0.5   (bf16 MXU operands, f32 accumulate)
        s = jax.lax.dot_general(
            q, k_n, (((1,), (1,)), ((), ())),
            preferred_element_type=jnp.float32) * scale      # (W, W) f32

        # self-attention mask: in the sorted layout a token attends itself
        # exactly when the key chunk is the (wrapped) center chunk and the
        # within-chunk slot matches -> static per-offset identity mask.
        if off % n_chunks == 0:
            s = jnp.where(row_ids == col_ids, SELF_ATTEN_VALUE, s)

        # bucket mask: only attend within the same bucket of this round.
        s = jnp.where(bq != bk_o, BUCKET_MASK_VALUE, s)

        # duplicate counts across rounds (static unroll over rounds).
        dup = jnp.zeros((W, W), jnp.int32)
        for r in range(round_num):
            dup = dup + (locq[:, r:r + 1] == lk_o[r:r + 1, :]).astype(jnp.int32)
        s = s - jnp.log(dup.astype(jnp.float32) + 1e-9)

        # online softmax update.
        m_new = jnp.maximum(m, jnp.max(s, axis=-1, keepdims=True))
        alpha = jnp.exp(m - m_new)
        p = jnp.exp(s - m_new)
        l = alpha * l + jnp.sum(p, axis=-1, keepdims=True)
        acc = alpha * acc + jnp.dot(p.astype(v_o.dtype), v_o,
                                    preferred_element_type=jnp.float32)
        m = m_new

    inv_l = pl.reciprocal(l, approx=True)        # EUP, deferred normalization
    vo_ref[0, 0] = (acc * inv_l).astype(vo_ref.dtype)
    lse_ref[0, 0] = m + jnp.log(l)


def lsh_chunk_attention(qk, v, bucket_col, bucket_row, loc_q, loc_k, *,
                        k_dim, round_num, attend_chunk_num):
    """qk/v: (G, C, W, K) bf16 sorted (NOT duplicated across chunks); qk feeds
    both the query (center chunk) and key (neighbour chunks, L2-normalized
    inside the kernel) streams.
    bucket_col: (G, C, W, 1) int32; bucket_row: (G, C, 1, W) int32.
    loc_q: (G, C, W, R) int32; loc_k: (G, C, R, W) int32."""
    G, C, W, K = qk.shape
    scale = float(k_dim) ** (-0.5)
    offsets = tuple(range(-attend_chunk_num, attend_chunk_num + 1))
    kernel = functools.partial(_lsh_attn_kernel, offsets, C, round_num, scale)

    def center(g, c):
        return (g, c, 0, 0)

    def neighbour(o):
        return lambda g, c: (g, (c + o + C) % C, 0, 0)

    in_specs = [
        pl.BlockSpec((1, 1, W, K), center),            # q (raw qk)
        pl.BlockSpec((1, 1, W, 1), center),            # bucket ids (q side)
        pl.BlockSpec((1, 1, W, round_num), center),    # loc (q side)
    ]
    in_arrays = [qk, bucket_col, loc_q]
    for o in offsets:                                  # keys (raw qk)
        in_specs.append(pl.BlockSpec((1, 1, W, K), neighbour(o)))
        in_arrays.append(qk)
    for o in offsets:                                  # values
        in_specs.append(pl.BlockSpec((1, 1, W, K), neighbour(o)))
        in_arrays.append(v)
    for o in offsets:                                  # bucket ids (key side)
        in_specs.append(pl.BlockSpec((1, 1, 1, W), neighbour(o)))
        in_arrays.append(bucket_row)
    for o in offsets:                                  # loc (key side)
        in_specs.append(pl.BlockSpec((1, 1, round_num, W), neighbour(o)))
        in_arrays.append(loc_k)

    vo, lse = pl.pallas_call(
        kernel,
        out_shape=(jax.ShapeDtypeStruct((G, C, W, K), jnp.float32),
                   jax.ShapeDtypeStruct((G, C, W, 1), jnp.float32)),
        grid=(G, C),
        in_specs=in_specs,
        out_specs=(pl.BlockSpec((1, 1, W, K), center),
                   pl.BlockSpec((1, 1, W, 1), center)),
        compiler_params=pltpu.CompilerParams(
            dimension_semantics=("parallel", "parallel"),
            vmem_limit_bytes=48 * 1024 * 1024),
    )(*in_arrays)
    return vo, lse


# ----------------------------------------------------------------------------
# Plain-JAX glue (hashing / sorting / gathering — data-dependent layout)
# ----------------------------------------------------------------------------
def gather_seq(arr, idx):
    # arr: (B, H, S, D), idx: (B, H, R, S) -> (B, H, R, S, D)
    return jax.vmap(jax.vmap(lambda a, i: a[i]))(arr, idx)


def init_params(key, d_model, head, k_dim, bucket_num, round_num):
    ks = jax.random.split(key, 7)
    lim = 1.0 / (d_model ** 0.5)

    def lin(kw, kb):
        w = jax.random.uniform(kw, (d_model, d_model), jnp.float32, -lim, lim)
        b = jax.random.uniform(kb, (1, d_model), jnp.float32, -lim, lim)
        return w, b

    wq, bq = lin(ks[0], ks[1])
    wv, bv = lin(ks[2], ks[3])
    wo, bo = lin(ks[4], ks[5])
    hash_vec = jax.random.normal(
        ks[6], (head, k_dim, bucket_num // 2, round_num), jnp.float32)
    return dict(wq=wq, bq=bq, wv=wv, bv=bv, wo=wo, bo=bo, hash_vec=hash_vec)


def lsh_attention_forward(params, x, *, head, k_dim, round_num,
                          bucket_num, attend_chunk_num):
    B, S, D = x.shape
    assert head * k_dim == D and S % bucket_num == 0 and bucket_num % 2 == 0
    C = bucket_num
    W = S // bucket_num

    # --- fused Q / V projection: one Pallas matmul over x ---
    x_flat = x.reshape(B * S, D)
    w_qv = jnp.concatenate([params['wq'], params['wv']], axis=1)   # (D, 2D)
    b_qv = jnp.concatenate([params['bq'], params['bv']], axis=1)   # (1, 2D)
    qv = pallas_linear(x_flat, w_qv, b_qv)                         # (B*S, 2D)
    qk = qv[:, :D].reshape(B, S, D)
    v = qv[:, D:].reshape(B, S, D)
    qk = qk.reshape(B, S, head, k_dim).transpose(0, 2, 1, 3)       # (B,H,S,K)
    v = v.reshape(B, S, head, k_dim).transpose(0, 2, 1, 3)

    # --- hashing ---
    rotated = jnp.einsum('bhsk,hkvr->bhsvr', qk, params['hash_vec'])
    rotated = jnp.concatenate([-rotated, rotated], axis=-2)
    buckets = jnp.argmax(rotated, axis=-2).astype(jnp.int32)     # (B,H,S,R)
    buckets = jnp.transpose(buckets, (0, 1, 3, 2))               # (B,H,R,S)

    ticker = jnp.arange(S, dtype=jnp.int32)
    buckets_off = buckets * S + ticker                           # (B,H,R,S)
    s_ticker = jnp.argsort(buckets_off, axis=-1).astype(jnp.int32)
    s_buckets = jnp.take_along_axis(buckets_off, s_ticker, axis=-1)
    undo_sort = jnp.argsort(s_ticker, axis=-1).astype(jnp.int32)

    # --- sort-gather qk / v (key normalization happens inside the kernel) ---
    s_qk = gather_seq(qk, s_ticker)                              # (B,H,R,S,K)
    s_v = gather_seq(v, s_ticker)

    # per-token bucket ids for every round, in this round's sorted order
    loc = jnp.transpose(buckets_off // S, (0, 1, 3, 2))          # (B,H,S,R)
    s_loc = gather_seq(loc, s_ticker)                            # (B,H,R,S,R)

    # --- Pallas chunked-attention kernel (no across_* HBM duplication) ---
    G = B * head * round_num
    qk_in = s_qk.reshape(G, C, W, k_dim).astype(jnp.bfloat16)
    v_in = s_v.reshape(G, C, W, k_dim).astype(jnp.bfloat16)
    bkt = (s_buckets // S).reshape(G, C, W).astype(jnp.int32)
    bucket_col = bkt.reshape(G, C, W, 1)
    bucket_row = bkt.reshape(G, C, 1, W)
    loc_q = s_loc.reshape(G, C, W, round_num).astype(jnp.int32)
    loc_k = jnp.swapaxes(loc_q, -1, -2)                          # (G,C,R,W)

    vo, lse = lsh_chunk_attention(
        qk_in, v_in, bucket_col, bucket_row, loc_q, loc_k,
        k_dim=k_dim, round_num=round_num, attend_chunk_num=attend_chunk_num)

    vo = vo.reshape(B, head, round_num, S, k_dim)
    lse = lse.reshape(B, head, round_num, S)

    # --- undo sort + combine rounds ---
    normal_vo = jnp.take_along_axis(
        vo, jnp.broadcast_to(undo_sort[..., None], vo.shape), axis=-2)
    normal_lse = jnp.take_along_axis(lse, undo_sort, axis=-1)
    lse_rounds = jax.nn.logsumexp(normal_lse, axis=-2, keepdims=True)
    round_w = jnp.exp(normal_lse - lse_rounds)
    normal_vo = (normal_vo * round_w[..., None]).sum(axis=2)     # (B,H,S,K)

    out = normal_vo.transpose(0, 2, 1, 3).reshape(B, S, D)
    out = pallas_linear(out.reshape(B * S, D), params['wo'],
                        params['bo']).reshape(B, S, D)
    # TODO(synk): nn.Dropout(p=0.1) omitted — eval/inference semantics (identity).
    # TODO(synk): optional input_mask path of the torch forward not implemented
    # (default call path uses input_mask=None).
    return out, buckets  # second return == (buckets // seq_len) of the torch code


# ----------------------------------------------------------------------------
if __name__ == "__main__":
    B, S = 2, 8
    head, k_dim = 2, 16
    d_model = head * k_dim           # 32
    round_num = 2
    bucket_num = 4                   # seq_len % bucket_num == 0, even
    attend_chunk_num = 1

    key = jax.random.PRNGKey(0)
    kx, kp = jax.random.split(key)
    x = jax.random.normal(kx, (B, S, d_model), jnp.float32)
    params = init_params(kp, d_model, head, k_dim, bucket_num, round_num)

    out, bucket_ids = lsh_attention_forward(
        params, x, head=head, k_dim=k_dim, round_num=round_num,
        bucket_num=bucket_num, attend_chunk_num=attend_chunk_num)
    out = jax.block_until_ready(out)
    bucket_ids = jax.block_until_ready(bucket_ids)

    assert out.shape == (B, S, d_model)
    assert bucket_ids.shape == (B, head, round_num, S)
    assert bool(jnp.all(jnp.isfinite(out)))
    print("KERNEL_OK")
</pallas_src>

<mosaic_0001>
module attributes {stable_mosaic.version = 11 : i64} {
  func.func @_linear_kernel(%arg0: i32, %arg1: memref<16x32xf32, #tpu.memory_space<vmem>>, %arg2: memref<32x64xf32, #tpu.memory_space<vmem>>, %arg3: memref<1x64xf32, #tpu.memory_space<vmem>>, %arg4: memref<16x64xf32, #tpu.memory_space<vmem>>) attributes {dimension_semantics = [#tpu.dimension_semantics<parallel>], iteration_bounds = array<i64: 1>, scalar_prefetch = 0 : i64, scratch_operands = 0 : i64, tpu.core_type = #tpu.core_type<tc>, window_params = [{transform_indices = @transform_0, window_bounds = array<i64: 16, 32>}, {pipeline_mode = #tpu.pipeline_mode<synchronous>, transform_indices = @transform_1, window_bounds = array<i64: 32, 64>}, {pipeline_mode = #tpu.pipeline_mode<synchronous>, transform_indices = @transform_2, window_bounds = array<i64: 1, 64>}, {transform_indices = @transform_3, window_bounds = array<i64: 16, 64>}]} {
    %c0 = arith.constant 0 : index
    %c0_0 = arith.constant 0 : index
    %0 = vector.load %arg1[%c0, %c0_0] : memref<16x32xf32, #tpu.memory_space<vmem>>, vector<16x32xf32>
    %c0_1 = arith.constant 0 : index
    %c0_2 = arith.constant 0 : index
    %1 = vector.load %arg2[%c0_1, %c0_2] : memref<32x64xf32, #tpu.memory_space<vmem>>, vector<32x64xf32>
    %cst = arith.constant dense<0.000000e+00> : vector<16x64xf32>
    %2 = tpu.matmul %0, %1, %cst {dimension_numbers = #tpu.dot_dimension_numbers<[1], [0], [0], [1], [0, 0, 1, 1], [], []>} : vector<16x32xf32>, vector<32x64xf32>, vector<16x64xf32> -> vector<16x64xf32>
    %c0_3 = arith.constant 0 : index
    %c0_4 = arith.constant 0 : index
    %3 = vector.load %arg3[%c0_3, %c0_4] : memref<1x64xf32, #tpu.memory_space<vmem>>, vector<1x64xf32>
    %4 = vector.broadcast %3 : vector<1x64xf32> to vector<16x64xf32>
    %5 = arith.addf %2, %4 : vector<16x64xf32>
    %c0_5 = arith.constant 0 : index
    %c0_6 = arith.constant 0 : index
    %6 = vector.load %arg4[%c0_5, %c0_6] : memref<16x64xf32, #tpu.memory_space<vmem>>, vector<16x64xf32>
    tpu.vector_store %arg4[%c0_5, %c0_6], %5 {strides = array<i32>} : memref<16x64xf32, #tpu.memory_space<vmem>>, vector<16x64xf32>,
    return
  }
  func.func @transform_0(%arg0: i32) -> (i32, i32) {
    %c0_i32 = arith.constant 0 : i32
    %c0_i32_0 = arith.constant 0 : i32
    return %arg0, %c0_i32 : i32, i32
  }
  func.func @transform_1(%arg0: i32) -> (i32, i32) {
    %c0_i32 = arith.constant 0 : i32
    %c0_i32_0 = arith.constant 0 : i32
    %c0_i32_1 = arith.constant 0 : i32
    return %c0_i32, %c0_i32_0 : i32, i32
  }
  func.func @transform_2(%arg0: i32) -> (i32, i32) {
    %c0_i32 = arith.constant 0 : i32
    %c0_i32_0 = arith.constant 0 : i32
    %c0_i32_1 = arith.constant 0 : i32
    return %c0_i32, %c0_i32_0 : i32, i32
  }
  func.func @transform_3(%arg0: i32) -> (i32, i32) {
    %c0_i32 = arith.constant 0 : i32
    %c0_i32_0 = arith.constant 0 : i32
    return %arg0, %c0_i32 : i32, i32
  }
}

</mosaic_0001>

<bundles_post_ra>
// kernel: tpu_custom_call.1
= control target key start
LH: loop header
LB: loop body
LE: loop exit
PB: predicated region body
PF: predicated region fallthrough
CT: control target
= control target key end

     0   :  { %8 = vsyncpa [#allocation3], 0  ;;  %s246_s0 = inlined_call_operand.hbm [shape: f32[16,32], index: 0, kind: input, shape index: {}]   ;;  %s247_s1 = inlined_call_operand.hbm [shape: f32[32,64], index: 1, kind: input, shape index: {}]   ;;  %s248_s2 = inlined_call_operand.vmem [shape: f32[1,64], index: 2, kind: input, shape index: {}]   ;;  %s249_s3 = inlined_call_operand.hbm [shape: f32[16,64], index: 3, kind: output, shape index: {}]  }
   0x1   :  { %9 = vsyncpa [#allocation6], 0 }
   0x2   :  { %10 = vsyncpa [#allocation4], 0  ;;  %s15_s14 = sshll.u32 %s246_s0, 4  ;;  %s200_s15 = smov [#allocation2]   ;;  %s16_s14 = int_to_ptr.hbm [resolvable:$true] %s15_s14 }
   0x3   :  { %s17_s16 = sshll.u32 %s200_s15, 4  ;;  %s28_s19 = sshll.u32 %s247_s1, 4  ;;  %s18_s16 = int_to_ptr.vmem [resolvable:$true] %s17_s16  ;;  %s29_s19 = int_to_ptr.hbm [resolvable:$true] %s28_s19 }
   0x4   :  { %s201_s20 = smov 128   ;;  %s202_s21 = smov 8  }
   0x5   :  { %23 = dma.hbm_to_vmem [thread:$0]  %s16_s14, 256, %s18_s16, [#allocation3], %s201_s20, %s201_s20, %s202_s21  }
   0x6   :  { %s203_s22 = smov [#allocation5]  }
   0x7   :  { %s30_s23 = sshll.u32 %s203_s22, 4  ;;  %s31_s23 = int_to_ptr.vmem [resolvable:$true] %s30_s23 }
   0x8   :  { %36 = dma.hbm_to_vmem [thread:$0]  %s29_s19, 512, %s31_s23, [#allocation6], %s201_s20, %s201_s20, %s202_s21  }
   0x9   :  { %194 = dma.done.wait [#allocation3], 256  }
   0xa   :  { %195 = vsyncadd [#allocation3], 4294967040 }
   0xb   :  { %196 = dma.done.wait [#allocation6], 512  }
   0xc   :  { %197 = vsyncadd [#allocation6], 4294966784  ;;  %v52_v0 = vld [vmem:[#allocation5 + $0x18] sm:$0xff]  ;;  %v51_v1 = vld [vmem:[#allocation5 + $0x10] sm:$0xff]  ;;  %vm57_vm0 = vcmask 261120   ;;  %s204_s24 = smov [#allocation7]  }
   0xd   :  { %76 = vmatpush.msra.mxu0 %v52_v0  ;;  %112 = vmatpush.msra.mxu1 %v52_v0  ;;  %v50_v2 = vld [vmem:[#allocation5 + $0x8] sm:$0xff]  ;;  %v49_v3 = vld [vmem:[#allocation5] sm:$0xff]  ;;  %v47_v4 = vld [vmem:[#allocation2] sm:$0xff]  ;;  %s94_s25 = sshll.u32 %s204_s24, 4  ;;  %s96_s28 = sshll.u32 %s249_s3, 4  ;;  %vm87_vm1 = vcmask 523264   ;;  %s95_s25 = int_to_ptr.vmem [resolvable:$true] %s94_s25  ;;  %s97_s28 = int_to_ptr.hbm [resolvable:$true] %s96_s28 }
   0xe   :  { %v48_v5 = vld [vmem:[#allocation2 + $0x8] sm:$0xff]  ;;  %v121_v6 = vld [vmem:[%s248_s2] ss:$0 sm:$0xff] }
   0xf   :  { %77 = vmatpush.msra.mxu0 %v51_v1  ;;  %113 = vmatpush.msra.mxu1 %v51_v1 }
  0x11   :  { %78 = vmatpush.msra.mxu0 %v50_v2  ;;  %114 = vmatpush.msra.mxu1 %v50_v2 }
  0x13   :  { %79 = vmatpush.msra.mxu0 %v49_v3  ;;  %115 = vmatpush.msra.mxu1 %v49_v3 }
  0x14   :  { %110 = vmatmul.msk.f32.vlgmr.msra.gmra.mxu0 %vm57_vm0, %v47_v4  ;;  %111 = vmatmul.msk.f32.vlgmr.msra.gmra.mxu1 %vm57_vm0, %v48_v5 }
  0x91   :  { %v81_v7 = vpop.f32.mrf.mxu0  ;;  %v84_v8 = vpop.f32.mrf.mxu1 }
  0x92   :  { %v82_v9 = vadd.f32 %v121_v6, %v81_v7  ;;  %v85_v10 = vadd.f32 %v121_v6, %v84_v8 }
  0x94   :  { %88 = vst.msk [vmem:[#allocation7] sm:$0xff] %vm87_vm1, %v82_v9 }
  0x95   :  { %89 = vst.msk [vmem:[#allocation7 + $0x8] sm:$0xff] %vm87_vm1, %v85_v10 }
  0x96   :  { %102 = dma.vmem_to_hbm [thread:$0]  %s95_s25, 256, %s97_s28, [#allocation4], %s201_s20, %s201_s20, %s202_s21  }
  0x97   :  { %198 = dma.done.wait [#allocation4], 256  }
  0x98   :  { %199 = vsyncadd [#allocation4], 4294967040 }
  0x99   :  { %107 = vsyncpa [#allocation3], 1 }
  0x9a   :  { %108 = vsyncpa [#allocation6], 1 }
  0x9b   :  { %109 = vsyncpa [#allocation4], 1 }

</bundles_post_ra>
